<compile_context>
chip_gen: v6e
topology: v6e:2x2x1
jax: 0.10.0
libtpu: 0.0.40
codegen_flags: <defaults>
</compile_context>

<pallas_src>
import jax
import jax.numpy as jnp
from jax import lax
from jax.experimental import pallas as pl
from jax.experimental.pallas import tpu as pltpu

# small, module-consistent sizes
C = 4          # num_channels
N = 8          # batch / node count
H = 32         # num_hiddens
NUM_HEADS = 4  # fixed in the module

# ---------------- packed weight-buffer geometry (single DMA) -----------------
_W_ROWS = 176
_W_LANES = 384
_R_WBIG = 0    # rows [0, 32)   : (H, 384) first-layer weights, 128-lane blocks
_R_BBIG = 32   # row 32         : (1, 384) first-layer biases
_R_WG2 = 33    # row 33         : (1, 128) jk wg2, zero-padded to 128 lanes
_R_BT = 34     # row 34         : (1, 256) [b_t | 0 | b_t @ wg1g | 0]
_R_W2AM = 40   # rows [40, 48)  : (8, 256) attn/mh score proj (row = score col)
_R_WT = 48     # rows [48, 176) : (128, 256) [w_t | 0 | w_t @ wg1g | 0]


# --------------------------- fused kernel -----------------------------------
def _channel_combine_kernel(h_ref, w_ref, out_ref):
    c, n, d = h_ref.shape
    hv = h_ref[...]                              # (C, N, H) f32
    h2 = hv.reshape(c * n, d)                    # (C*N, H), leading-dim merge

    # ---------------- mean ----------------
    out_ref[0] = jnp.sum(hv, axis=0) * (1.0 / c)

    # ---- ONE fused first-layer matmul: [attn | 4 mh heads | jk local] ------
    wbig = w_ref[_R_WBIG:_R_WBIG + d, :]                         # (H, 384)
    bbig = w_ref[_R_BBIG:_R_BBIG + 1, :]                         # (1, 384)
    z = jnp.dot(h2, wbig, preferred_element_type=jnp.float32) + bbig   # (C*N, 384)

    # ---- transform + jk global term: ONE K=C*H matmul ----------------------
    # hcat[n, c*H:(c+1)*H] = h[c, n, :]  (lane concat, no transpose/reshape of
    # the lane dim).  Columns 0:128 of wtb hold w_t (zero-padded), columns
    # 128:256 hold w_t @ wg1[H:], pre-composed at pack time.
    hcat = jnp.concatenate([hv[i] for i in range(c)], axis=-1)   # (N, C*H)
    wtb = w_ref[_R_WT:_R_WT + c * d, 0:256]                      # (C*H, 256)
    btb = w_ref[_R_BT:_R_BT + 1, 0:256]                          # (1, 256)
    both = jnp.dot(hcat, wtb, preferred_element_type=jnp.float32) + btb  # (N, 256)
    out_ref[1] = both[:, 0:d]                                    # gh = transform out
    gt128 = both[:, 128:256]        # g_term = gh @ wg1[H:], real in lanes 0:H

    # ---- attn + multi_head: one score matmul, ONE joint channel softmax ----
    zam = z[:, 0:256]                                            # aligned 2-block slice
    lane = lax.broadcasted_iota(jnp.int32, zam.shape, 1)
    act = jnp.where(lane < 128, jnp.tanh(zam), jnp.maximum(zam, 0.0))
    w2amT = w_ref[_R_W2AM:_R_W2AM + 8, 0:256]                    # (8, 256)
    scores = lax.dot_general(act, w2amT, (((1,), (1,)), ((), ())),
                             preferred_element_type=jnp.float32)  # (C*N, 8)
    scores = scores.reshape(c, n, 8)           # col 0: attn, cols 1..4: heads
    m = jnp.max(scores, axis=0, keepdims=True)
    e = jnp.exp(scores - m)
    p = e / jnp.sum(e, axis=0, keepdims=True)  # exact softmax over channels
    p_attn = p[:, :, 0:1]                                        # (C, N, 1)
    p_mh = jnp.sum(p[:, :, 1:1 + NUM_HEADS], axis=-1,
                   keepdims=True) * (1.0 / NUM_HEADS)            # (C, N, 1)
    out_ref[2] = jnp.sum(p_attn * hv, axis=0)
    out_ref[3] = jnp.sum(p_mh * hv, axis=0)

    # ------------------ jk (NO softmax, matching the module) -----------------
    zjk = z[:, 256:384].reshape(c, n, 128)                       # aligned slice
    wg2 = w_ref[_R_WG2:_R_WG2 + 1, 0:128]                        # (1, 128), 0-padded
    zj = jnp.tanh(zjk + gt128[None, :, :])                       # (C, N, 128)
    sj = jnp.sum(zj * wg2, axis=-1)                              # (C, N)
    out_ref[4] = jnp.sum(sj[:, :, None] * hv, axis=0)


# ------------------- init-time weight repacking (free) ----------------------
def pack_params(p):
    """One-time repack of all module parameters into ONE lane-dense buffer."""
    wg1g = p["wg1"][H:]                                          # gh-half of wg1
    wtg = jnp.dot(p["w_t"], wg1g, precision=lax.Precision.HIGHEST)   # (C*H, H)
    btg = jnp.dot(p["b_t"], wg1g, precision=lax.Precision.HIGHEST)   # (H,)
    w_mh = jnp.transpose(p["w1s"], (1, 0, 2)).reshape(H, NUM_HEADS * H)

    W = jnp.zeros((_W_ROWS, _W_LANES), jnp.float32)
    # first-layer weights, each logical block 128-lane aligned
    W = W.at[_R_WBIG:_R_WBIG + H, 0:H].set(p["w1"])               # attn
    W = W.at[_R_WBIG:_R_WBIG + H, 128:256].set(w_mh)              # 4 mh heads
    W = W.at[_R_WBIG:_R_WBIG + H, 256:256 + H].set(p["wg1"][:H])  # jk local half
    # first-layer biases
    W = W.at[_R_BBIG, 0:H].set(p["b1"])
    W = W.at[_R_BBIG, 128:256].set(p["b1s"].reshape(-1))
    W = W.at[_R_BBIG, 256:256 + H].set(p["bg1"])
    # jk final projection wg2, zero-padded to 128 lanes
    W = W.at[_R_WG2, 0:H].set(p["wg2"])
    # transform bias and pre-composed jk global bias
    W = W.at[_R_BT, 0:H].set(p["b_t"])
    W = W.at[_R_BT, 128:128 + H].set(btg)
    # attn / multi_head score projections (row = score column, col = feature)
    W = W.at[_R_W2AM + 0, 0:H].set(p["w2"])
    for k in range(NUM_HEADS):
        W = W.at[_R_W2AM + 1 + k, 128 + k * H:128 + (k + 1) * H].set(p["w2s"][k])
    # transform weight and pre-composed jk global weight
    W = W.at[_R_WT:_R_WT + C * H, 0:H].set(p["w_t"])
    W = W.at[_R_WT:_R_WT + C * H, 128:128 + H].set(wtg)
    return W


# ------------------------------- wrapper -------------------------------------
def channel_combine_all(h, w_packed):
    c, n, d = h.shape
    vmem = pl.BlockSpec(memory_space=pltpu.MemorySpace.VMEM)
    cost = pl.CostEstimate(
        flops=2 * (c * n * d * _W_LANES + n * (c * d) * 256 + c * n * 256 * 8),
        transcendentals=c * n * (256 + 128 + 8),
        bytes_accessed=h.size * 4 + w_packed.size * 4 + 5 * n * d * 4,
    )
    out = pl.pallas_call(
        _channel_combine_kernel,
        in_specs=[vmem, vmem],
        out_specs=vmem,
        out_shape=jax.ShapeDtypeStruct((5, n, d), jnp.float32),
        cost_estimate=cost,
    )(h, w_packed)
    # stacked order: [mean, transform, attn, multi_head, jk]
    return out[0], out[1], out[2], out[3], out[4]


channel_combine_jit = jax.jit(channel_combine_all)


# -------------------------- pure-JAX references ------------------------------
def ref_mean(h):
    return jnp.mean(h, axis=0)


def ref_transform(h, w_t, b_t):
    c, n, d = h.shape
    hflat = jnp.transpose(h, (1, 0, 2)).reshape(n, c * d)
    return hflat @ w_t + b_t


def ref_attn(h, w1, b1, w2):
    s = jnp.tanh(h @ w1 + b1) @ w2[:, None]          # (C, N, 1)
    attn = jax.nn.softmax(s, axis=0)
    return jnp.sum(attn * h, axis=0)


def ref_multi_head(h, w1s, b1s, w2s):
    attns = []
    for k in range(NUM_HEADS):
        s = jax.nn.relu(h @ w1s[k] + b1s[k]) @ w2s[k][:, None]
        attns.append(jax.nn.softmax(s, axis=0))
    attn = jnp.mean(jnp.stack(attns, axis=0), axis=0)
    return jnp.sum(attn * h, axis=0)


def ref_jk(h, w_t, b_t, wg1, bg1, wg2):
    c, n, d = h.shape
    gh = jnp.transpose(h, (1, 0, 2)).reshape(n, c * d) @ w_t + b_t
    gh_b = jnp.broadcast_to(gh[None], (c, n, d))
    lg = jnp.concatenate([h, gh_b], axis=-1)
    attn = jnp.tanh(lg @ wg1 + bg1) @ wg2[:, None]
    return jnp.sum(h * attn, axis=0)


# ------------------------------- main ----------------------------------------
if __name__ == "__main__":
    key = jax.random.PRNGKey(0)
    ks = jax.random.split(key, 12)

    def init(k, shape, scale=0.1):
        return (jax.random.normal(k, shape) * scale).astype(jnp.float32)

    # input: (num_channels, batch, num_hiddens)
    h = init(ks[0], (C, N, H), scale=1.0)

    params = dict(
        # 'transform' / 'jk' transformation: Linear(H*C -> H)
        w_t=init(ks[1], (C * H, H)), b_t=init(ks[2], (H,)),
        # 'attn': Linear(H->H) + Tanh + Linear(H->1, no bias)
        w1=init(ks[3], (H, H)), b1=init(ks[4], (H,)), w2=init(ks[5], (H,)),
        # 'multi_head': 4 heads of Linear(H->H) + ReLU + Linear(H->1, no bias)
        w1s=init(ks[6], (NUM_HEADS, H, H)), b1s=init(ks[7], (NUM_HEADS, H)),
        w2s=init(ks[8], (NUM_HEADS, H)),
        # 'jk' global attention: Linear(2H->H) + Tanh + Linear(H->1, no bias)
        wg1=init(ks[9], (2 * H, H)), bg1=init(ks[10], (H,)), wg2=init(ks[11], (H,)),
    )

    w_packed = pack_params(params)

    outs = jax.block_until_ready(channel_combine_jit(h, w_packed))
    mean_o, trans_o, attn_o, mh_o, jk_o = outs

    results = {
        "mean": (mean_o, ref_mean(h)),
        "transform": (trans_o, ref_transform(h, params["w_t"], params["b_t"])),
        "attn": (attn_o, ref_attn(h, params["w1"], params["b1"], params["w2"])),
        "multi_head": (mh_o, ref_multi_head(h, params["w1s"], params["b1s"],
                                            params["w2s"])),
        "jk": (jk_o, ref_jk(h, params["w_t"], params["b_t"], params["wg1"],
                            params["bg1"], params["wg2"])),
    }

    # Exact softmax now -> much tighter tolerances than before.  Residual
    # differences come only from f32 MXU accumulation order / the pre-composed
    # w_t @ wg1[H:] re-association in the jk branch.
    tol = {"mean": 1e-5, "transform": 1e-3, "attn": 1e-3,
           "multi_head": 1e-3, "jk": 2e-3}

    for name, (got, want) in results.items():
        got = jax.block_until_ready(got)
        assert got.shape == (N, H), (name, got.shape)
        err = float(jnp.max(jnp.abs(got - want)))
        assert jnp.allclose(got, want, rtol=tol[name], atol=tol[name]), (name, err)

    print("KERNEL_OK")
</pallas_src>

<mosaic_0001>
module attributes {stable_mosaic.version = 11 : i64} {
  func.func @_channel_combine_kernel(%arg0: memref<4x8x32xf32, #tpu.memory_space<vmem>>, %arg1: memref<176x384xf32, #tpu.memory_space<vmem>>, %arg2: memref<5x8x32xf32, #tpu.memory_space<vmem>>) attributes {dimension_semantics = [], scalar_prefetch = 0 : i64, scratch_operands = 0 : i64, tpu.core_type = #tpu.core_type<tc>} {
    %c0 = arith.constant 0 : index
    %c0_0 = arith.constant 0 : index
    %c0_1 = arith.constant 0 : index
    %0 = vector.load %arg0[%c0, %c0_0, %c0_1] : memref<4x8x32xf32, #tpu.memory_space<vmem>>, vector<4x8x32xf32>
    %1 = vector.shape_cast %0 : vector<4x8x32xf32> to vector<32x32xf32>
    %cst = arith.constant dense<0.000000e+00> : vector<8x32xf32>
    %2 = vector.multi_reduction <add>, %0, %cst [0] : vector<4x8x32xf32> to vector<8x32xf32>
    %cst_2 = arith.constant 2.500000e-01 : f32
    %3 = vector.broadcast %cst_2 : f32 to vector<8x32xf32>
    %4 = arith.mulf %2, %3 : vector<8x32xf32>
    %c0_3 = arith.constant 0 : index
    %c0_4 = arith.constant 0 : index
    %c0_5 = arith.constant 0 : index
    %5 = vector.load %arg2[%c0_3, %c0_4, %c0_5] : memref<5x8x32xf32, #tpu.memory_space<vmem>>, vector<1x8x32xf32>
    %6 = vector.shape_cast %5 : vector<1x8x32xf32> to vector<8x32xf32>
    %7 = vector.shape_cast %4 : vector<8x32xf32> to vector<1x8x32xf32>
    tpu.vector_store %arg2[%c0_3, %c0_4, %c0_5], %7 {strides = array<i32>} : memref<5x8x32xf32, #tpu.memory_space<vmem>>, vector<1x8x32xf32>,
    %c0_6 = arith.constant 0 : index
    %c0_7 = arith.constant 0 : index
    %8 = vector.load %arg1[%c0_6, %c0_7] : memref<176x384xf32, #tpu.memory_space<vmem>>, vector<32x384xf32>
    %c32 = arith.constant 32 : index
    %c0_8 = arith.constant 0 : index
    %9 = vector.load %arg1[%c32, %c0_8] : memref<176x384xf32, #tpu.memory_space<vmem>>, vector<1x384xf32>
    %cst_9 = arith.constant dense<0.000000e+00> : vector<32x384xf32>
    %10 = tpu.matmul %1, %8, %cst_9 {dimension_numbers = #tpu.dot_dimension_numbers<[1], [0], [0], [1], [0, 0, 1, 1], [], []>} : vector<32x32xf32>, vector<32x384xf32>, vector<32x384xf32> -> vector<32x384xf32>
    %11 = vector.broadcast %9 : vector<1x384xf32> to vector<32x384xf32>
    %12 = arith.addf %10, %11 : vector<32x384xf32>
    %13 = vector.extract_strided_slice %0 {offsets = [0, 0, 0], sizes = [1, 8, 32], strides = [1, 1, 1]} : vector<4x8x32xf32> to vector<1x8x32xf32>
    %14 = vector.shape_cast %13 : vector<1x8x32xf32> to vector<8x32xf32>
    %15 = vector.extract_strided_slice %0 {offsets = [1, 0, 0], sizes = [1, 8, 32], strides = [1, 1, 1]} : vector<4x8x32xf32> to vector<1x8x32xf32>
    %16 = vector.shape_cast %15 : vector<1x8x32xf32> to vector<8x32xf32>
    %17 = vector.extract_strided_slice %0 {offsets = [2, 0, 0], sizes = [1, 8, 32], strides = [1, 1, 1]} : vector<4x8x32xf32> to vector<1x8x32xf32>
    %18 = vector.shape_cast %17 : vector<1x8x32xf32> to vector<8x32xf32>
    %19 = vector.extract_strided_slice %0 {offsets = [3, 0, 0], sizes = [1, 8, 32], strides = [1, 1, 1]} : vector<4x8x32xf32> to vector<1x8x32xf32>
    %20 = vector.shape_cast %19 : vector<1x8x32xf32> to vector<8x32xf32>
    %21 = tpu.concatenate %14, %16, %18, %20 in 1 : vector<8x32xf32>, vector<8x32xf32>, vector<8x32xf32>, vector<8x32xf32> -> vector<8x128xf32>
    %c48 = arith.constant 48 : index
    %c0_10 = arith.constant 0 : index
    %22 = vector.load %arg1[%c48, %c0_10] : memref<176x384xf32, #tpu.memory_space<vmem>>, vector<128x256xf32>
    %c34 = arith.constant 34 : index
    %c0_11 = arith.constant 0 : index
    %23 = vector.load %arg1[%c34, %c0_11] : memref<176x384xf32, #tpu.memory_space<vmem>>, vector<1x256xf32>
    %cst_12 = arith.constant dense<0.000000e+00> : vector<8x256xf32>
    %24 = tpu.matmul %21, %22, %cst_12 {dimension_numbers = #tpu.dot_dimension_numbers<[1], [0], [0], [1], [0, 0, 1, 1], [], []>} : vector<8x128xf32>, vector<128x256xf32>, vector<8x256xf32> -> vector<8x256xf32>
    %25 = vector.broadcast %23 : vector<1x256xf32> to vector<8x256xf32>
    %26 = arith.addf %24, %25 : vector<8x256xf32>
    %27 = vector.extract_strided_slice %26 {offsets = [0, 0], sizes = [8, 32], strides = [1, 1]} : vector<8x256xf32> to vector<8x32xf32>
    %c1 = arith.constant 1 : index
    %c0_13 = arith.constant 0 : index
    %c0_14 = arith.constant 0 : index
    %28 = vector.load %arg2[%c1, %c0_13, %c0_14] : memref<5x8x32xf32, #tpu.memory_space<vmem>>, vector<1x8x32xf32>
    %29 = vector.shape_cast %28 : vector<1x8x32xf32> to vector<8x32xf32>
    %30 = vector.shape_cast %27 : vector<8x32xf32> to vector<1x8x32xf32>
    tpu.vector_store %arg2[%c1, %c0_13, %c0_14], %30 {strides = array<i32>} : memref<5x8x32xf32, #tpu.memory_space<vmem>>, vector<1x8x32xf32>,
    %31 = vector.extract_strided_slice %26 {offsets = [0, 128], sizes = [8, 128], strides = [1, 1]} : vector<8x256xf32> to vector<8x128xf32>
    %32 = vector.extract_strided_slice %12 {offsets = [0, 0], sizes = [32, 256], strides = [1, 1]} : vector<32x384xf32> to vector<32x256xf32>
    %33 = tpu.iota {dimensions = array<i32: 1>} : vector<32x256xi32>
    %c128_i32 = arith.constant 128 : i32
    %34 = vector.broadcast %c128_i32 : i32 to vector<32x256xi32>
    %35 = arith.cmpi slt, %33, %34 : vector<32x256xi32>
    %36 = math.tanh %32 : vector<32x256xf32>
    %cst_15 = arith.constant 0.000000e+00 : f32
    %37 = vector.broadcast %cst_15 : f32 to vector<32x256xf32>
    %38 = arith.maximumf %32, %37 : vector<32x256xf32>
    %39 = arith.select %35, %36, %38 : vector<32x256xi1>, vector<32x256xf32>
    %c40 = arith.constant 40 : index
    %c0_16 = arith.constant 0 : index
    %40 = vector.load %arg1[%c40, %c0_16] : memref<176x384xf32, #tpu.memory_space<vmem>>, vector<8x256xf32>
    %cst_17 = arith.constant dense<0.000000e+00> : vector<32x8xf32>
    %41 = tpu.matmul %39, %40, %cst_17 {dimension_numbers = #tpu.dot_dimension_numbers<[1], [1], [0], [0], [0, 0, 1, 0], [], []>} : vector<32x256xf32>, vector<8x256xf32>, vector<32x8xf32> -> vector<32x8xf32>
    %42 = vector.shape_cast %41 : vector<32x8xf32> to vector<4x8x8xf32>
    %cst_18 = arith.constant dense<0xFF800000> : vector<8x8xf32>
    %43 = vector.multi_reduction <maximumf>, %42, %cst_18 [0] : vector<4x8x8xf32> to vector<8x8xf32>
    %44 = vector.shape_cast %43 : vector<8x8xf32> to vector<1x8x8xf32>
    %45 = vector.broadcast %44 : vector<1x8x8xf32> to vector<4x8x8xf32>
    %46 = arith.subf %42, %45 : vector<4x8x8xf32>
    %47 = math.exp %46 : vector<4x8x8xf32>
    %cst_19 = arith.constant dense<0.000000e+00> : vector<8x8xf32>
    %48 = vector.multi_reduction <add>, %47, %cst_19 [0] : vector<4x8x8xf32> to vector<8x8xf32>
    %49 = vector.shape_cast %48 : vector<8x8xf32> to vector<1x8x8xf32>
    %50 = vector.broadcast %49 : vector<1x8x8xf32> to vector<4x8x8xf32>
    %51 = arith.divf %47, %50 : vector<4x8x8xf32>
    %52 = vector.extract_strided_slice %51 {offsets = [0, 0, 0], sizes = [4, 8, 1], strides = [1, 1, 1]} : vector<4x8x8xf32> to vector<4x8x1xf32>
    %53 = vector.extract_strided_slice %51 {offsets = [0, 0, 1], sizes = [4, 8, 4], strides = [1, 1, 1]} : vector<4x8x8xf32> to vector<4x8x4xf32>
    %cst_20 = arith.constant dense<0.000000e+00> : vector<4x8xf32>
    %54 = vector.multi_reduction <add>, %53, %cst_20 [2] : vector<4x8x4xf32> to vector<4x8xf32>
    %55 = vector.shape_cast %54 : vector<4x8xf32> to vector<4x8x1xf32>
    %cst_21 = arith.constant 2.500000e-01 : f32
    %56 = vector.broadcast %cst_21 : f32 to vector<4x8x1xf32>
    %57 = arith.mulf %55, %56 : vector<4x8x1xf32>
    %58 = vector.broadcast %52 : vector<4x8x1xf32> to vector<4x8x32xf32>
    %59 = arith.mulf %58, %0 : vector<4x8x32xf32>
    %cst_22 = arith.constant dense<0.000000e+00> : vector<8x32xf32>
    %60 = vector.multi_reduction <add>, %59, %cst_22 [0] : vector<4x8x32xf32> to vector<8x32xf32>
    %c2 = arith.constant 2 : index
    %c0_23 = arith.constant 0 : index
    %c0_24 = arith.constant 0 : index
    %61 = vector.load %arg2[%c2, %c0_23, %c0_24] : memref<5x8x32xf32, #tpu.memory_space<vmem>>, vector<1x8x32xf32>
    %62 = vector.shape_cast %61 : vector<1x8x32xf32> to vector<8x32xf32>
    %63 = vector.shape_cast %60 : vector<8x32xf32> to vector<1x8x32xf32>
    tpu.vector_store %arg2[%c2, %c0_23, %c0_24], %63 {strides = array<i32>} : memref<5x8x32xf32, #tpu.memory_space<vmem>>, vector<1x8x32xf32>,
    %64 = vector.broadcast %57 : vector<4x8x1xf32> to vector<4x8x32xf32>
    %65 = arith.mulf %64, %0 : vector<4x8x32xf32>
    %cst_25 = arith.constant dense<0.000000e+00> : vector<8x32xf32>
    %66 = vector.multi_reduction <add>, %65, %cst_25 [0] : vector<4x8x32xf32> to vector<8x32xf32>
    %c3 = arith.constant 3 : index
    %c0_26 = arith.constant 0 : index
    %c0_27 = arith.constant 0 : index
    %67 = vector.load %arg2[%c3, %c0_26, %c0_27] : memref<5x8x32xf32, #tpu.memory_space<vmem>>, vector<1x8x32xf32>
    %68 = vector.shape_cast %67 : vector<1x8x32xf32> to vector<8x32xf32>
    %69 = vector.shape_cast %66 : vector<8x32xf32> to vector<1x8x32xf32>
    tpu.vector_store %arg2[%c3, %c0_26, %c0_27], %69 {strides = array<i32>} : memref<5x8x32xf32, #tpu.memory_space<vmem>>, vector<1x8x32xf32>,
    %70 = vector.extract_strided_slice %12 {offsets = [0, 256], sizes = [32, 128], strides = [1, 1]} : vector<32x384xf32> to vector<32x128xf32>
    %71 = vector.shape_cast %70 : vector<32x128xf32> to vector<4x8x128xf32>
    %c33 = arith.constant 33 : index
    %c0_28 = arith.constant 0 : index
    %72 = vector.load %arg1[%c33, %c0_28] : memref<176x384xf32, #tpu.memory_space<vmem>>, vector<1x128xf32>
    %73 = vector.shape_cast %31 : vector<8x128xf32> to vector<1x8x128xf32>
    %74 = vector.broadcast %73 : vector<1x8x128xf32> to vector<4x8x128xf32>
    %75 = arith.addf %71, %74 : vector<4x8x128xf32>
    %76 = math.tanh %75 : vector<4x8x128xf32>
    %77 = vector.shape_cast %72 : vector<1x128xf32> to vector<1x1x128xf32>
    %78 = vector.broadcast %77 : vector<1x1x128xf32> to vector<4x8x128xf32>
    %79 = arith.mulf %76, %78 : vector<4x8x128xf32>
    %cst_29 = arith.constant dense<0.000000e+00> : vector<4x8xf32>
    %80 = vector.multi_reduction <add>, %79, %cst_29 [2] : vector<4x8x128xf32> to vector<4x8xf32>
    %81 = vector.shape_cast %80 : vector<4x8xf32> to vector<4x8x1xf32>
    %82 = vector.broadcast %81 : vector<4x8x1xf32> to vector<4x8x32xf32>
    %83 = arith.mulf %82, %0 : vector<4x8x32xf32>
    %cst_30 = arith.constant dense<0.000000e+00> : vector<8x32xf32>
    %84 = vector.multi_reduction <add>, %83, %cst_30 [0] : vector<4x8x32xf32> to vector<8x32xf32>
    %c4 = arith.constant 4 : index
    %c0_31 = arith.constant 0 : index
    %c0_32 = arith.constant 0 : index
    %85 = vector.load %arg2[%c4, %c0_31, %c0_32] : memref<5x8x32xf32, #tpu.memory_space<vmem>>, vector<1x8x32xf32>
    %86 = vector.shape_cast %85 : vector<1x8x32xf32> to vector<8x32xf32>
    %87 = vector.shape_cast %84 : vector<8x32xf32> to vector<1x8x32xf32>
    tpu.vector_store %arg2[%c4, %c0_31, %c0_32], %87 {strides = array<i32>} : memref<5x8x32xf32, #tpu.memory_space<vmem>>, vector<1x8x32xf32>,
    return
  }
}

</mosaic_0001>

<bundles_post_ra>
// kernel: channel_combine_all.1
= control target key start
LH: loop header
LB: loop body
LE: loop exit
PB: predicated region body
PF: predicated region fallthrough
CT: control target
= control target key end

     0   :  { %7 = vsyncpa [#allocation3], 0  ;;  %s909_s0 = inlined_call_operand.hbm [shape: f32[4,8,32], index: 0, kind: input, shape index: {}]   ;;  %s910_s1 = inlined_call_operand.hbm [shape: f32[176,384], index: 1, kind: input, shape index: {}]   ;;  %s911_s2 = inlined_call_operand.vmem [shape: f32[5,8,32], index: 2, kind: output, shape index: {}]  }
   0x1   :  { %8 = vsyncpa [#allocation5], 0  ;;  %s782_s9 = smov [#allocation2]  }
   0x2   :  { %s14_s10 = sshll.u32 %s782_s9, 4  ;;  %s15_s10 = int_to_ptr.vmem [resolvable:$true] %s14_s10 }
   0x3   :  { %s746_s11 = scalar_lea.vmem %s15_s10, 512  ;;  %p751_p1 = scmp.lt.s32.totalorder %s15_s10, %s15_s10 }
   0x4   :  { %p747_p0 = scmp.ne.s32.totalorder %s15_s10, %s746_s11  ;;  %p752_p2 = scmp.lt.s32.totalorder %s746_s11, %s746_s11 }
   0x6   :  { %p753_p3 = por %p752_p2, %p751_p1 }
   0x8   :  { %p754_p4 = pnand %p753_p3, %p747_p0 }
   0xa   :  { %757 = shalt.err (!%p754_p4)
}
   0xb   :  { %s783_s12 = smov 128   ;;  %s784_s13 = smov 8  }
   0xc   :  { %20 = dma.hbm_to_vmem [thread:$0]  %s909_s0, 512, %s15_s10, [#allocation3], %s783_s12, %s783_s12, %s784_s13  }
   0xd   :  { %s785_s16 = smov [#allocation4]  }
   0xe   :  { %s26_s17 = sshll.u32 %s785_s16, 4  ;;  %s27_s17 = int_to_ptr.vmem [resolvable:$true] %s26_s17 }
   0xf   :  { %s766_s18 = scalar_lea.vmem %s27_s17, 8448  ;;  %p771_p6 = scmp.lt.s32.totalorder %s27_s17, %s27_s17 }
  0x10   :  { %p767_p5 = scmp.ne.s32.totalorder %s27_s17, %s766_s18  ;;  %p772_p7 = scmp.lt.s32.totalorder %s766_s18, %s766_s18 }
  0x12   :  { %p773_p8 = por %p772_p7, %p771_p6 }
  0x14   :  { %p774_p9 = pnand %p773_p8, %p767_p5 }
  0x16   :  { %777 = shalt.err (!%p774_p9)
}
  0x17   :  { %s786_s19 = smov 384   ;;  %s787_s20 = smov 24  }
  0x18   :  { %32 = dma.hbm_to_vmem [thread:$0]  %s910_s1, 8448, %s27_s17, [#allocation5], %s786_s19, %s786_s19, %s787_s20  }
  0x19   :  { %778 = dma.done.wait [#allocation3], 512  }
  0x1a   :  { %779 = vsyncadd [#allocation3], 4294966784 }
  0x1b   :  { %780 = dma.done.wait [#allocation5], 8448  }
  0x1c   :  { %781 = vsyncadd [#allocation5], 4294958848  ;;  %v788_v0 = vmov 0.0   ;;  %v63_v1 = vld [vmem:[#allocation4 + $0x50] sm:$0xff]  ;;  %v62_v2 = vld [vmem:[#allocation4 + $0x48] sm:$0xff]  ;;  %vm43_vm0 = vcmask 261120  }
  0x1d   :  { %159 = vmatprep.mubr.f32.mxu0 %v788_v0  ;;  %v60_v3 = vld [vmem:[#allocation4 + $0x38] sm:$0xff]  ;;  %119 = vmatprep.subr.mxu0 %v63_v1  ;;  %v59_v4 = vld [vmem:[#allocation4 + $0x30] sm:$0xff]  ;;  %v57_v5 = vld [vmem:[#allocation4 + $0x20] sm:$0xff]  ;;  %s789_s0 = smov 32   ;;  %s790_s1 = smov 96   ;;  %vm279_vm1 = vcmask 523264   ;;  %v68_v1 = vlaneseq }
  0x1e   :  { %120 = vmatpush1.msra.mxu0 %v62_v2  ;;  %v816_v6 = vld [vmem:[#allocation2] sm:$0xff]  ;;  %v56_v7 = vld [vmem:[#allocation4 + $0x18] sm:$0xff]  ;;  %v820_v9 = vld [vmem:[#allocation2 + $0x8] sm:$0xff]  ;;  %s791_s23 = smov 64   ;;  %vm281_vm2 = vcmask 785408   ;;  %vm517_vm3 = vcmask 64512  }
  0x1f   :  { %121 = vmatprep.subr.mxu0 %v60_v3  ;;  %v44_v8 = vsel %vm43_vm0, %v816_v6, 0.0  ;;  %v822_v10 = vld [vmem:[#allocation2 + $0x10] sm:$0xff]  ;;  %692 = vmatprep.mubr.msk.f32.mxu1 %vm43_vm0, %v816_v6  ;;  %v54_v11 = vld [vmem:[#allocation4 + $0x8] sm:$0xff]  ;;  %v45_v12 = vsel %vm43_vm0, %v820_v9, 0.0  ;;  %v830_v14 = vld [vmem:[#allocation2 + $0x18] sm:$0xff]  ;;  %v69_v2 = vshrl.u32 %v68_v1, 7 }
  0x20   :  { %122 = vmatpush1.msra.mxu0 %v59_v4  ;;  %v47_v13 = vsel %vm43_vm0, %v822_v10, 0.0  ;;  %269 = vrot.lane.b32.xlu0 %v820_v9, %s789_s0  ;;  %v53_v15 = vld [vmem:[#allocation4] sm:$0xff]  ;;  %v46_v16 = vadd.f32 %v45_v12, %v44_v8  ;;  %v49_v17 = vsel %vm43_vm0, %v830_v14, 0.0  ;;  %v313_v20 = vld [vmem:[#allocation4 + $0x1f8] sm:$0xff]  ;;  %v312_v21 = vld [vmem:[#allocation4 + $0x1e8] sm:$0xff]  ;;  %s793_s28 = smov 127  }
  0x21   :  { %123 = vmatprep.subr.mxu0 %v57_v5  ;;  %275 = vrot.lane.b32.xlu1 %v830_v14, %s790_s1  ;;  %v314_v18 = vld [vmem:[#allocation4 + $0x200] sm:$0xff]  ;;  %v310_v24 = vld [vmem:[#allocation4 + $0x1d0] sm:$0xff]  ;;  %v64_v25 = vld [vmem:[#allocation4 + $0x58] sm:$0xff]  ;;  %v70_v3 = vsub.s32 0, %v69_v2  ;;  %v74_v5 = vsub.s32 1, %v69_v2  ;;  %vm565_vm4 = vcmask 31744  }
  0x22   :  { %124 = vmatpush1.msra.mxu0 %v56_v7  ;;  %v48_v19 = vadd.f32 %v47_v13, %v46_v16  ;;  %v311_v23 = vld [vmem:[#allocation4 + $0x1e0] sm:$0xff]  ;;  %v309_v27 = vld [vmem:[#allocation4 + $0x1c8] sm:$0xff]  ;;  %684 = vmatprep.subr.mxu1 %v64_v25  ;;  %v308_v28 = vld [vmem:[#allocation4 + $0x1b8] sm:$0xff] }
  0x23   :  { %125 = vmatprep.subr.mxu0 %v54_v11  ;;  %685 = vmatpush3.msra.mxu1 %v64_v25  ;;  %v61_v29 = vld [vmem:[#allocation4 + $0x40] sm:$0xff]  ;;  %v307_v30 = vld [vmem:[#allocation4 + $0x1b0] sm:$0xff]  ;;  %v305_v32 = vld [vmem:[#allocation4 + $0x198] sm:$0xff] }
  0x24   :  { %126 = vmatpush1.msra.mxu0 %v53_v15  ;;  %272 = vrot.lane.b32.xlu0 %v822_v10, %s791_s23  ;;  %v50_v22 = vadd.f32 %v49_v17, %v48_v19  ;;  %v306_v31 = vld [vmem:[#allocation4 + $0x1a0] sm:$0xff]  ;;  %v304_v33 = vld [vmem:[#allocation4 + $0x188] sm:$0xff]  ;;  %v302_v36 = vld [vmem:[#allocation4 + $0x170] sm:$0xff] }
  0x25   :  { %664 = vmatmul.mubr.msk.f32.vlgmr.msra.gmra.mxu0 %vm43_vm0, %v816_v6  ;;  %328 = vmatprep.subr.mxu0 %v314_v18  ;;  %v58_v34 = vld [vmem:[#allocation4 + $0x28] sm:$0xff]  ;;  %v303_v35 = vld [vmem:[#allocation4 + $0x180] sm:$0xff]  ;;  %v55_v38 = vld [vmem:[#allocation4 + $0x10] sm:$0xff] }
  0x26   :  { %165 = vmatprep.mubr.f32.mxu0 %v788_v0  ;;  %329 = vmatpush1.msra.mxu0 %v313_v20  ;;  %v51_v26 = vmul.f32 0.25, %v50_v22  ;;  %v301_v37 = vld [vmem:[#allocation4 + $0x168] sm:$0xff]  ;;  %v300_v39 = vld [vmem:[#allocation4 + $0x158] sm:$0xff]  ;;  %v299_v40 = vld [vmem:[#allocation4 + $0x150] sm:$0xff] }
  0x27   :  { %330 = vmatprep.subr.mxu0 %v312_v21  ;;  %686 = vmatprep.subr.mxu1 %v61_v29  ;;  %v298_v41 = vld [vmem:[#allocation4 + $0x140] sm:$0xff]  ;;  %v297_v42 = vld [vmem:[#allocation4 + $0x138] sm:$0xff]  ;;  %v296_v43 = vld [vmem:[#allocation4 + $0x128] sm:$0xff]  ;;  %v78_v21 = vsub.s32 2, %v69_v2 }
  0x28   :  { %331 = vmatpush1.msra.mxu0 %v311_v23  ;;  %52 = vst.msk [vmem:[%s911_s2] sm:$0xff] %vm43_vm0, %v51_v26  ;;  %687 = vmatpush3.msra.mxu1 %v61_v29  ;;  %v295_v44 = vld [vmem:[#allocation4 + $0x120] sm:$0xff]  ;;  %v294_v45 = vld [vmem:[#allocation4 + $0x110] sm:$0xff]  ;;  %v293_v46 = vld [vmem:[#allocation4 + $0x108] sm:$0xff] }
  0x29   :  { %665 = vmatmul.mubr.msk.f32.gmra.mxu0 %vm43_vm0, %v820_v9  ;;  %332 = vmatprep.subr.mxu0 %v310_v24  ;;  %v292_v47 = vld [vmem:[#allocation4 + $0xf8] sm:$0xff]  ;;  %v291_v48 = vld [vmem:[#allocation4 + $0xf0] sm:$0xff]  ;;  %v290_v49 = vld [vmem:[#allocation4 + $0xe0] sm:$0xff] }
  0x2a   :  { %171 = vmatprep.mubr.f32.mxu0 %v788_v0  ;;  %333 = vmatpush1.msra.mxu0 %v309_v27  ;;  %v289_v50 = vld [vmem:[#allocation4 + $0xd8] sm:$0xff]  ;;  %v288_v51 = vld [vmem:[#allocation4 + $0xc8] sm:$0xff]  ;;  %v287_v52 = vld [vmem:[#allocation4 + $0xc0] sm:$0xff] }
  0x2b   :  { %334 = vmatprep.subr.mxu0 %v308_v28  ;;  %688 = vmatprep.subr.mxu1 %v58_v34  ;;  %v286_v53 = vld [vmem:[#allocation4 + $0xb0] sm:$0xff]  ;;  %v285_v54 = vld [vmem:[#allocation4 + $0xa8] sm:$0xff]  ;;  %v284_v55 = vld [vmem:[#allocation4 + $0x98] sm:$0xff] }
  0x2c   :  { %335 = vmatpush1.msra.mxu0 %v307_v30  ;;  %689 = vmatpush3.msra.mxu1 %v58_v34  ;;  %v283_v56 = vld [vmem:[#allocation4 + $0x90] sm:$0xff]  ;;  %v431_v57 = vld [vmem:[#allocation4 + $0x80] sm:$0xff]  ;;  %v430_v58 = vld [vmem:[#allocation4 + $0x78] sm:$0xff] }
  0x2d   :  { %666 = vmatmul.mubr.msk.f32.gmra.mxu0 %vm43_vm0, %v822_v10  ;;  %336 = vmatprep.subr.mxu0 %v306_v31  ;;  %v66_v4 = vld [vmem:[#allocation4 + $0x60] ss:$8 sm:$0x7] }
  0x2e   :  { %177 = vmatprep.mubr.f32.mxu0 %v788_v0  ;;  %337 = vmatpush1.msra.mxu0 %v305_v32  ;;  %v71_v7 = vrot.slane %v66_v4, %v70_v3  ;;  %v75_v8 = vrot.slane %v66_v4, %v74_v5  ;;  %v79_v26 = vrot.slane %v66_v4, %v78_v21 }
  0x2f   :  { %338 = vmatprep.subr.mxu0 %v304_v33  ;;  %690 = vmatprep.subr.mxu1 %v55_v38 }
  0x30   :  { %339 = vmatpush1.msra.mxu0 %v303_v35  ;;  %691 = vmatpush3.msra.mxu1 %v55_v38 }
  0x31   :  { %667 = vmatmul.mubr.msk.f32.gmra.mxu0 %vm43_vm0, %v830_v14  ;;  %340 = vmatprep.subr.mxu0 %v302_v36 }
  0x32   :  { %341 = vmatpush1.msra.mxu0 %v301_v37  ;;  %693 = vmatmul.mubr.msk.f32.vlgmr.msra.gmra.mxu1 %vm43_vm0, %v820_v9 }
  0x33   :  { %342 = vmatprep.subr.mxu0 %v300_v39  ;;  %695 = vmatprep.mubr.msk.f32.mxu1 %vm43_vm0, %v822_v10 }
  0x34   :  { %343 = vmatpush1.msra.mxu0 %v299_v40  ;;  %392 = vmatprep.mubr.f32.mxu0 %v788_v0 }
  0x35   :  { %344 = vmatprep.subr.mxu0 %v298_v41  ;;  %462 = vmatprep.subr.mxu1 %v431_v57  ;;  %v624_v57 = vld [vmem:[#allocation4 + $0x61] ss:$0 sm:$0xff] }
  0x36   :  { %345 = vmatpush1.msra.mxu0 %v297_v42  ;;  %696 = vmatmul.mubr.msk.f32.gmra.mxu1 %vm43_vm0, %v830_v14 }
  0x37   :  { %346 = vmatprep.subr.mxu0 %v296_v43  ;;  %463 = vmatpush1.xpose.msra.mxu1 %v430_v58  ;;  %v316_v43 = vld [vmem:[#allocation4 + $0x62] ss:$8 sm:$0x3] }
  0x38   :  { %347 = vmatpush1.msra.mxu0 %v295_v44  ;;  %v321_v44 = vrot.slane %v316_v43, %v70_v3 }
  0x39   :  { %348 = vmatprep.subr.mxu0 %v294_v45 }
  0x3a   :  { %349 = vmatpush1.msra.mxu0 %v293_v46  ;;  %v325_v46 = vrot.slane %v316_v43, %v74_v5 }
  0x3b   :  { %350 = vmatprep.subr.mxu0 %v292_v47 }
  0x3c   :  { %351 = vmatpush1.msra.mxu0 %v291_v48 }
  0x3d   :  { %352 = vmatprep.subr.mxu0 %v290_v49 }
  0x3e   :  { %353 = vmatpush1.msra.mxu0 %v289_v50 }
  0x3f   :  { %354 = vmatprep.subr.mxu0 %v288_v51 }
  0x40   :  { %355 = vmatpush1.msra.mxu0 %v287_v52 }
  0x41   :  { %356 = vmatprep.subr.mxu0 %v286_v53 }
  0x42   :  { %357 = vmatpush1.msra.mxu0 %v285_v54 }
  0x43   :  { %358 = vmatprep.subr.mxu0 %v284_v55 }
  0x44   :  { %359 = vmatpush1.msra.mxu0 %v283_v56 }
  0x92   :  { %v270_v59 = vpop.permute.xlu0 %269 }
  0x93   :  { %v278_v60 = vsel %vm43_vm0, %v816_v6, %v270_v59  ;;  %v276_v61 = vpop.permute.xlu1 %275 }
  0x96   :  { %v273_v62 = vpop.permute.xlu0 %272 }
  0x97   :  { %v280_v63 = vsel %vm279_vm1, %v278_v60, %v273_v62 }
  0x98   :  { %v282_v0 = vsel %vm281_vm2, %v280_v63, %v276_v61 }
  0x99   :  { %393 = vmatmul.mubr.f32.vlgmr.msra.gmra.mxu0 %v282_v0 }
  0xe5   :  { %v161_v11 = vpop.f32.mrf.mxu0 }
  0xe6   :  { %v162_v12 = vadd.f32 %v161_v11, %v71_v7 }
  0xe7   :  { %v163_v13 = vpop.f32.mrf.mxu0 }
  0xe8   :  { %712 = vtanh.f32 %v162_v12  ;;  %v164_v15 = vadd.f32 %v163_v13, %v75_v8 }
  0xe9   :  { %v167_v16 = vpop.f32.mrf.mxu0 }
  0xea   :  { %v415_v17 = vmax.f32 %v164_v15, 0.0  ;;  %v168_v18 = vadd.f32 %v167_v16, %v71_v7 }
  0xeb   :  { %v169_v19 = vpop.f32.mrf.mxu0 }
  0xec   :  { %714 = vtanh.f32 %v168_v18  ;;  %496 = vmatprep.mubr.f32.mxu1 %v415_v17  ;;  %v170_v24 = vadd.f32 %v169_v19, %v75_v8 }
  0xed   :  { %v173_v20 = vpop.f32.mrf.mxu0 }
  0xee   :  { %v174_v22 = vadd.f32 %v173_v20, %v71_v7  ;;  %v417_v30 = vmax.f32 %v170_v24, 0.0 }
  0xef   :  { %v175_v23 = vpop.f32.mrf.mxu0 }
  0xf0   :  { %716 = vtanh.f32 %v174_v22  ;;  %v176_v31 = vadd.f32 %v175_v23, %v75_v8 }
  0xf1   :  { %v179_v25 = vpop.f32.mrf.mxu0 }
  0xf2   :  { %v180_v27 = vadd.f32 %v179_v25, %v71_v7  ;;  %v694_v28 = vpop.f32.mrf.mxu1  ;;  %v419_v37 = vmax.f32 %v176_v31, 0.0 }
  0xf3   :  { %v256_v32 = vadd.f32 %v694_v28, %v79_v26  ;;  %v181_v33 = vpop.f32.mrf.mxu0 }
  0xf4   :  { %718 = vtanh.f32 %v180_v27  ;;  %v250_v34 = vpop.f32.mrf.mxu1  ;;  %v182_v38 = vadd.f32 %v181_v33, %v75_v8 }
  0xf5   :  { %v713_v29 = vpop.eup %712  ;;  %v251_v49 = vadd.f32 %v250_v34, %v79_v26 }
  0xf6   :  { %497 = vmatmul.mubr.f32.vlgmr.msra.gmra.mxu1 %v713_v29  ;;  %v697_v35 = vpop.f32.mrf.mxu1  ;;  %v421_v41 = vmax.f32 %v182_v38, 0.0 }
  0xf7   :  { %501 = vmatprep.mubr.f32.mxu1 %v417_v30  ;;  %v266_v39 = vadd.f32 %v697_v35, %v79_v26 }
  0xf8   :  { %v260_v45 = vpop.f32.mrf.mxu1 }
  0xf9   :  { %v715_v36 = vpop.eup %714  ;;  %v261_v50 = vadd.f32 %v260_v45, %v79_v26 }
  0xfa   :  { %502 = vmatmul.mubr.f32.gmra.mxu1 %v715_v36 }
  0xfb   :  { %506 = vmatprep.mubr.f32.mxu1 %v419_v37 }
  0xfd   :  { %v717_v40 = vpop.eup %716 }
  0xfe   :  { %507 = vmatmul.mubr.f32.gmra.mxu1 %v717_v40  ;;  %v792_v40 = vmov 0  }
  0xff   :  { %511 = vmatprep.mubr.f32.mxu1 %v421_v41  ;;  %711 = vset.pattern.permute.xlu1 %v792_v40 }
 0x100   :  { %710 = vset.pattern.permute.xlu0 %v792_v40 }
 0x101   :  { %v719_v42 = vpop.eup %718 }
 0x102   :  { %512 = vmatmul.mubr.f32.gmra.mxu1 %v719_v42 }
 0x159   :  { %v394_v47 = vpop.f32.mrf.mxu0 }
 0x15a   :  { %v395_v48 = vadd.f32 %v394_v47, %v321_v44 }
 0x15b   :  { %v396_v51 = vpop.f32.mrf.mxu0 }
 0x15c   :  { %672 = vst.msk [vmem:[%s911_s2 + $0x8] sm:$0xff] %vm43_vm0, %v395_v48  ;;  %v397_v52 = vadd.f32 %v396_v51, %v325_v46 }
 0x15e   :  { %v625_v53 = vadd.f32 %v397_v52, %v251_v49  ;;  %v626_v54 = vadd.f32 %v397_v52, %v256_v32  ;;  %v628_v55 = vadd.f32 %v397_v52, %v266_v39  ;;  %v627_v56 = vadd.f32 %v397_v52, %v261_v50 }
 0x160   :  { %720 = vtanh.f32 %v625_v53 }
 0x161   :  { %722 = vtanh.f32 %v626_v54 }
 0x162   :  { %724 = vtanh.f32 %v628_v55 }
 0x163   :  { %726 = vtanh.f32 %v627_v56 }
 0x16d   :  { %v721_v58 = vpop.eup %720 }
 0x16e   :  { %v723_v59 = vpop.eup %722  ;;  %v633_v60 = vmul.f32 %v721_v58, %v624_v57 }
 0x16f   :  { %v725_v61 = vpop.eup %724  ;;  %v634_v62 = vmul.f32 %v723_v59, %v624_v57 }
 0x170   :  { %v727_v63 = vpop.eup %726  ;;  %637 = vadd.xlane.f32.xlu1 %v633_v60  ;;  %v636_v0 = vmul.f32 %v725_v61, %v624_v57 }
 0x171   :  { %v635_v1 = vmul.f32 %v727_v63, %v624_v57 }
 0x1b6   :  { %v498_v2 = vpop.f32.mrf.mxu1 }
 0x1b7   :  { %v518_v13 = vsel %vm517_vm3, %v498_v2, -inf }
 0x1b8   :  { %v500_v3 = vpop.f32.mrf.mxu1 }
 0x1ba   :  { %v503_v4 = vpop.f32.mrf.mxu1 }
 0x1bb   :  { %v519_v11 = vsel %vm517_vm3, %v503_v4, -inf }
 0x1bc   :  { %v505_v5 = vpop.f32.mrf.mxu1  ;;  %v522_v17 = vmax.f32 %v518_v13, %v519_v11 }
 0x1be   :  { %v508_v7 = vpop.f32.mrf.mxu1 }
 0x1bf   :  { %v520_v15 = vsel %vm517_vm3, %v508_v7, -inf }
 0x1c0   :  { %v510_v8 = vpop.f32.mrf.mxu1 }
 0x1c2   :  { %v513_v12 = vpop.f32.mrf.mxu1 }
 0x1c3   :  { %v521_v16 = vsel %vm517_vm3, %v513_v12, -inf }
 0x1c4   :  { %v523_v18 = vmax.f32 %v520_v15, %v521_v16  ;;  %v515_v19 = vpop.f32.mrf.mxu1 }
 0x1c6   :  { %v524_v20 = vmax.f32 %v522_v17, %v523_v18 }
 0x1c8   :  { %v525_v21 = vsub.f32 %v498_v2, %v524_v20  ;;  %v526_v22 = vsub.f32 %v503_v4, %v524_v20  ;;  %v527_v23 = vsub.f32 %v508_v7, %v524_v20  ;;  %v528_v24 = vsub.f32 %v513_v12, %v524_v20 }
 0x1ca   :  { %v529_v25 = vmul.f32 1.442695, %v525_v21  ;;  %v531_v26 = vmul.f32 1.442695, %v526_v22  ;;  %v533_v27 = vmul.f32 1.442695, %v527_v23 }
 0x1cb   :  { %v535_v28 = vmul.f32 1.442695, %v528_v24 }
 0x1cc   :  { %728 = vpow2.f32 %v529_v25 }
 0x1cd   :  { %730 = vpow2.f32 %v531_v26 }
 0x1ce   :  { %732 = vpow2.f32 %v533_v27 }
 0x1cf   :  { %734 = vpow2.f32 %v535_v28 }
 0x1d9   :  { %v729_v29 = vpop.eup %728 }
 0x1da   :  { %v731_v30 = vpop.eup %730  ;;  %v537_v31 = vsel %vm517_vm3, %v729_v29, 0.0 }
 0x1db   :  { %v733_v32 = vpop.eup %732  ;;  %v538_v33 = vsel %vm517_vm3, %v731_v30, 0.0 }
 0x1dc   :  { %v735_v34 = vpop.eup %734  ;;  %v539_v35 = vadd.f32 %v538_v33, %v537_v31  ;;  %v540_v36 = vsel %vm517_vm3, %v733_v32, 0.0 }
 0x1dd   :  { %v542_v38 = vsel %vm517_vm3, %v735_v34, 0.0 }
 0x1de   :  { %v541_v37 = vadd.f32 %v540_v36, %v539_v35 }
 0x1e0   :  { %v543_v39 = vadd.f32 %v542_v38, %v541_v37 }
 0x1e2   :  { %736 = vrcp.f32 %v543_v39 }
 0x1ef   :  { %v737_v41 = vpop.eup %736 }
 0x1f0   :  { %v546_v42 = vmul.f32 %v737_v41, %v731_v30  ;;  %v545_v43 = vmul.f32 %v737_v41, %v729_v29  ;;  %v548_v44 = vmul.f32 %v737_v41, %v735_v34  ;;  %v547_v45 = vmul.f32 %v737_v41, %v733_v32 }
 0x1f2   :  { %555 = vrot.lane.b32.xlu0 %v546_v42, %s793_s28  ;;  %553 = vrot.lane.b32.xlu1 %v545_v43, %s793_s28 }
 0x1f6   :  { %559 = vrot.lane.b32.xlu0 %v548_v44, %s793_s28  ;;  %557 = vrot.lane.b32.xlu1 %v547_v45, %s793_s28 }
 0x1f9   :  { %v638_v46 = vpop.xlane.xlu1 %637 }
 0x1fa   :  { %v645_v56 = vmul.f32 %v638_v46, %v816_v6 }
 0x1fc   :  { %v649_v60 = vsel %vm43_vm0, %v645_v56, 0.0 }
 0x215   :  { %639 = vadd.xlane.f32.xlu0 %v634_v62 }
 0x219   :  { %641 = vadd.xlane.f32.xlu0 %v635_v1 }
 0x21a   :  { %643 = vadd.xlane.f32.xlu1 %v636_v0 }
 0x264   :  { %v556_v47 = vpop.permute.xlu0 %555  ;;  %v554_v48 = vpop.permute.xlu1 %553 }
 0x265   :  { %v569_v49 = vsel %vm565_vm4, %v556_v47, 0.0  ;;  %v566_v50 = vsel %vm565_vm4, %v554_v48, 0.0 }
 0x266   :  { %570 = vadd.xlane.f32.xlu0 %v569_v49  ;;  %567 = vadd.xlane.f32.xlu1 %v566_v50 }
 0x268   :  { %v558_v51 = vpop.permute.xlu1 %557  ;;  %v560_v53 = vpop.permute.xlu0 %559 }
 0x269   :  { %v572_v52 = vsel %vm565_vm4, %v558_v51, 0.0  ;;  %v575_v55 = vsel %vm565_vm4, %v560_v53, 0.0 }
 0x26a   :  { %573 = vadd.xlane.f32.xlu0 %v572_v52 }
 0x277   :  { %587 = vperm.xlu1 %711, %v546_v42  }
 0x27b   :  { %591 = vperm.xlu1 %711, %v547_v45  }
 0x280   :  { %583 = vperm.xlu0 %710, %v545_v43  }
 0x29e   :  { %v640_v54 = vpop.xlane.xlu0 %639 }
 0x29f   :  { %v646_v57 = vmul.f32 %v640_v54, %v820_v9  ;;  %576 = vadd.xlane.f32.xlu1 %v575_v55 }
 0x2a1   :  { %v650_v58 = vsel %vm43_vm0, %v646_v57, 0.0 }
 0x2a2   :  { %v642_v59 = vpop.xlane.xlu0 %641  ;;  %v651_v63 = vadd.f32 %v650_v58, %v649_v60 }
 0x2a3   :  { %v647_v61 = vmul.f32 %v642_v59, %v822_v10  ;;  %v644_v62 = vpop.xlane.xlu1 %643 }
 0x2a4   :  { %v648_v0 = vmul.f32 %v644_v62, %v830_v14 }
 0x2a5   :  { %v652_v1 = vsel %vm43_vm0, %v647_v61, 0.0 }
 0x2a6   :  { %v653_v2 = vadd.f32 %v652_v1, %v651_v63  ;;  %v654_v3 = vsel %vm43_vm0, %v648_v0, 0.0 }
 0x2a8   :  { %v655_v4 = vadd.f32 %v654_v3, %v653_v2 }
 0x2aa   :  { %675 = vst.msk [vmem:[%s911_s2 + $0x20] sm:$0xff] %vm43_vm0, %v655_v4 }
 0x2b0   :  { %595 = vperm.xlu1 %711, %v548_v44  }
 0x2ef   :  { %v571_v5 = vpop.xlane.xlu0 %570  ;;  %v568_v7 = vpop.xlane.xlu1 %567 }
 0x2f0   :  { %v579_v12 = vmul.f32 0.25, %v571_v5  ;;  %v578_v13 = vmul.f32 0.25, %v568_v7 }
 0x2f2   :  { %v612_v17 = vmul.f32 %v579_v12, %v820_v9  ;;  %v611_v18 = vmul.f32 %v578_v13, %v816_v6 }
 0x2f3   :  { %v574_v8 = vpop.xlane.xlu0 %573  ;;  %v588_v11 = vpop.permute.xlu1 %587 }
 0x2f4   :  { %v580_v16 = vmul.f32 0.25, %v574_v8  ;;  %v599_v22 = vmul.f32 %v588_v11, %v820_v9  ;;  %v616_v23 = vsel %vm43_vm0, %v612_v17, 0.0  ;;  %v615_v24 = vsel %vm43_vm0, %v611_v18, 0.0 }
 0x2f6   :  { %v613_v21 = vmul.f32 %v580_v16, %v822_v10  ;;  %v603_v28 = vsel %vm43_vm0, %v599_v22, 0.0 }
 0x2f7   :  { %v592_v20 = vpop.permute.xlu1 %591 }
 0x2f8   :  { %v618_v27 = vsel %vm43_vm0, %v613_v21, 0.0  ;;  %v600_v29 = vmul.f32 %v592_v20, %v822_v10 }
 0x2fa   :  { %v605_v34 = vsel %vm43_vm0, %v600_v29, 0.0 }
 0x2fb   :  { %v584_v15 = vpop.permute.xlu0 %583 }
 0x2fc   :  { %v598_v19 = vmul.f32 %v584_v15, %v816_v6  ;;  %v617_v6 = vadd.f32 %v616_v23, %v615_v24 }
 0x2fe   :  { %v602_v25 = vsel %vm43_vm0, %v598_v19, 0.0  ;;  %v619_v33 = vadd.f32 %v618_v27, %v617_v6 }
 0x2ff   :  { %v604_v31 = vadd.f32 %v603_v28, %v602_v25 }
 0x301   :  { %v606_v38 = vadd.f32 %v605_v34, %v604_v31 }
 0x328   :  { %v577_v26 = vpop.xlane.xlu1 %576 }
 0x329   :  { %v581_v30 = vmul.f32 0.25, %v577_v26 }
 0x32b   :  { %v614_v32 = vmul.f32 %v581_v30, %v830_v14 }
 0x32c   :  { %v596_v9 = vpop.permute.xlu1 %595 }
 0x32d   :  { %v620_v35 = vsel %vm43_vm0, %v614_v32, 0.0  ;;  %v601_v36 = vmul.f32 %v596_v9, %v830_v14 }
 0x32e   :  { %v621_v37 = vadd.f32 %v620_v35, %v619_v33 }
 0x32f   :  { %v607_v39 = vsel %vm43_vm0, %v601_v36, 0.0 }
 0x330   :  { %674 = vst.msk [vmem:[%s911_s2 + $0x18] sm:$0xff] %vm43_vm0, %v621_v37  ;;  %v608_v10 = vadd.f32 %v607_v39, %v606_v38 }
 0x332   :  { %673 = vst.msk [vmem:[%s911_s2 + $0x10] sm:$0xff] %vm43_vm0, %v608_v10 }
 0x333   :  { %662 = vsyncpa [#allocation3], 1 }
 0x334   :  { %663 = vsyncpa [#allocation5], 1 }

</bundles_post_ra>
